<compile_context>
chip_gen: v5e
topology: v5e:2x2
jax: 0.10.0
libtpu: 0.0.40
codegen_flags: <defaults>
</compile_context>

<pallas_src>
import functools

import jax
import jax.numpy as jnp
from jax import lax
from jax.experimental import pallas as pl
from jax.experimental.pallas import tpu as pltpu


def _tln_kernel(x_ref, w_ref, b_ref, o_ref, *, eps: float, inv_c: float):
    """LayerNorm over the channel (sublane) axis of a (1, C, tT) tile.

    x_ref: (1, C, tT) input block (native [B, C, T] layout)
    w_ref: (C, 1)     scale (gamma), broadcast along lanes
    b_ref: (C, 1)     shift (beta)
    o_ref: (1, C, tT) output block
    """
    x = x_ref[...].astype(jnp.float32)                      # (1, C, tT) f32 working copy
    # Single pass over C: sum and sum-of-squares, then E[x^2] - mean^2 (f32).
    mean = jnp.sum(x, axis=1, keepdims=True) * inv_c        # (1, 1, tT)
    ex2 = jnp.sum(x * x, axis=1, keepdims=True) * inv_c     # (1, 1, tT)
    var = jnp.maximum(ex2 - mean * mean, 0.0)               # guard tiny cancellation
    inv = lax.rsqrt(var + eps)                              # (1, 1, tT)
    w = w_ref[...].astype(jnp.float32)[None]                # (1, C, 1)
    b = b_ref[...].astype(jnp.float32)[None]                # (1, C, 1)
    y = (x - mean) * inv * w + b
    o_ref[...] = y.astype(o_ref.dtype)


def _per_step_budget_bytes() -> int:
    """Generation-aware budget for ONE grid step's total VMEM footprint."""
    try:
        kind = jax.devices()[0].device_kind.lower()
    except Exception:
        kind = ""
    if "v5 lite" in kind or "v5e" in kind or "v5litepod" in kind:
        return 10 << 20   # 16 MiB default scoped VMEM -> leave headroom
    if "v6" in kind:
        return 24 << 20   # 128 MiB physical / 32 MiB default scoped; raise limit below
    if "v7" in kind:
        return 20 << 20   # only 64 MiB physical per TC -> be less aggressive
    return 12 << 20       # unknown / older gens: conservative


def _per_col_bytes(C: int, in_itemsize: int, out_itemsize: int) -> int:
    """VMEM bytes per T column for one grid step (double-buffered I/O + f32 temps)."""
    return C * (2 * in_itemsize + 2 * out_itemsize + 2 * 4)


def _pick_t_tile(C: int, T: int, B: int, in_itemsize: int, out_itemsize: int,
                 budget_bytes: int) -> int:
    """Largest lane tile (multiple of 128) whose full working set fits the budget."""
    if T <= 128:
        return T  # full-extent last dim is always legal (sub-128 lanes -> masked stores)
    per_col = max(_per_col_bytes(C, in_itemsize, out_itemsize), 1)
    t = (budget_bytes // per_col) // 128 * 128
    t = max(128, min(t, max(128, (T // 128) * 128)))   # don't exceed T; keep 128-multiple
    # Megacore: if B is small, keep >= ~4 total grid steps so v7x's 2nd TC has work.
    min_steps = 4
    if B * pl.cdiv(T, t) < min_steps and T >= 2 * 128:
        target_t_steps = -(-min_steps // B)
        t_cap = max(128, (-(-T // target_t_steps)) // 128 * 128)
        t = min(t, t_cap)
    return int(t)


def transposed_layer_norm(x, weight, bias, *, eps: float = 1e-5, t_tile: int | None = None):
    """Equivalent of TransposedLayerNorm.forward for x of shape [B, C, T]."""
    B, C, T = x.shape
    assert weight.shape == (C,) and bias.shape == (C,)

    in_isz = jnp.dtype(x.dtype).itemsize
    out_isz = in_isz
    if t_tile is None:
        t_tile = _pick_t_tile(C, T, B, in_isz, out_isz, _per_step_budget_bytes())

    # Explicit scoped-VMEM limit derived from the actual working set (+2 MiB headroom),
    # clamped to something that is legal on every generation (v7x has 64 MiB physical).
    est = _per_col_bytes(C, in_isz, out_isz) * t_tile + (2 << 20)
    vmem_limit = int(min(max(est, 16 << 20), 64 << 20))

    # Affine params as (C, 1) columns so they broadcast over the T (lane) axis.
    w2 = weight.reshape(C, 1)
    b2 = bias.reshape(C, 1)

    kernel = functools.partial(_tln_kernel, eps=eps, inv_c=1.0 / C)

    grid = (B, pl.cdiv(T, t_tile))
    return pl.pallas_call(
        kernel,
        out_shape=jax.ShapeDtypeStruct((B, C, T), x.dtype),
        grid_spec=pltpu.PrefetchScalarGridSpec(
            num_scalar_prefetch=0,
            grid=grid,
            in_specs=[
                pl.BlockSpec((1, C, t_tile), lambda bi, ti: (bi, 0, ti)),
                pl.BlockSpec((C, 1), lambda bi, ti: (0, 0)),
                pl.BlockSpec((C, 1), lambda bi, ti: (0, 0)),
            ],
            out_specs=pl.BlockSpec((1, C, t_tile), lambda bi, ti: (bi, 0, ti)),
        ),
        compiler_params=pltpu.CompilerParams(
            dimension_semantics=("parallel", "parallel"),
            vmem_limit_bytes=vmem_limit,
        ),
    )(x, w2, b2)


def _reference(x, weight, bias, eps=1e-5):
    # Pure-JAX reference of the PyTorch module (transpose -> LayerNorm -> transpose).
    xt = jnp.transpose(x, (0, 2, 1)).astype(jnp.float32)
    mean = jnp.mean(xt, axis=-1, keepdims=True)
    var = jnp.mean((xt - mean) ** 2, axis=-1, keepdims=True)
    y = (xt - mean) * lax.rsqrt(var + eps) * weight.astype(jnp.float32) + bias.astype(jnp.float32)
    return jnp.transpose(y, (0, 2, 1))


if __name__ == "__main__":
    key = jax.random.PRNGKey(0)

    # Small cases: T <= 128 (full-extent lane block), ragged T (cdiv grid + masked edge
    # block), and a bf16 case exercising the dtype-aware tile sizing.
    cases = [
        ((2, 32, 64), jnp.float32, 1e-4),
        ((2, 48, 200), jnp.float32, 1e-4),
        ((1, 64, 384), jnp.bfloat16, 3e-2),
    ]
    for (B, C, T), dtype, tol in cases:
        kx, kw, kb, key = jax.random.split(key, 4)
        x = jax.random.normal(kx, (B, C, T), dtype=jnp.float32).astype(dtype)
        weight = (1.0 + 0.1 * jax.random.normal(kw, (C,), dtype=jnp.float32)).astype(dtype)
        bias = (0.1 * jax.random.normal(kb, (C,), dtype=jnp.float32)).astype(dtype)

        out = jax.block_until_ready(transposed_layer_norm(x, weight, bias))
        ref = _reference(x, weight, bias)
        assert out.shape == (B, C, T)
        assert jnp.allclose(out.astype(jnp.float32), ref, atol=tol, rtol=tol), (B, C, T, dtype)

    print("KERNEL_OK")
</pallas_src>

<mosaic_0001>
module attributes {stable_mosaic.version = 11 : i64} {
  func.func @_tln_kernel(%arg0: i32, %arg1: i32, %arg2: memref<1x32x64xf32, #tpu.memory_space<vmem>>, %arg3: memref<32x1xf32, #tpu.memory_space<vmem>>, %arg4: memref<32x1xf32, #tpu.memory_space<vmem>>, %arg5: memref<1x32x64xf32, #tpu.memory_space<vmem>>) attributes {dimension_semantics = [#tpu.dimension_semantics<parallel>, #tpu.dimension_semantics<parallel>], iteration_bounds = array<i64: 2, 1>, scalar_prefetch = 0 : i64, scratch_operands = 0 : i64, tpu.core_type = #tpu.core_type<tc>, window_params = [{transform_indices = @transform_0, window_bounds = array<i64: 1, 32, 64>}, {pipeline_mode = #tpu.pipeline_mode<synchronous>, transform_indices = @transform_1, window_bounds = array<i64: 32, 1>}, {pipeline_mode = #tpu.pipeline_mode<synchronous>, transform_indices = @transform_2, window_bounds = array<i64: 32, 1>}, {transform_indices = @transform_3, window_bounds = array<i64: 1, 32, 64>}]} {
    %c0 = arith.constant 0 : index
    %c0_0 = arith.constant 0 : index
    %c0_1 = arith.constant 0 : index
    %0 = vector.load %arg2[%c0, %c0_0, %c0_1] : memref<1x32x64xf32, #tpu.memory_space<vmem>>, vector<1x32x64xf32>
    %cst = arith.constant dense<0.000000e+00> : vector<1x64xf32>
    %1 = vector.multi_reduction <add>, %0, %cst [1] : vector<1x32x64xf32> to vector<1x64xf32>
    %2 = vector.shape_cast %1 : vector<1x64xf32> to vector<1x1x64xf32>
    %cst_2 = arith.constant 3.125000e-02 : f32
    %3 = vector.broadcast %cst_2 : f32 to vector<1x1x64xf32>
    %4 = arith.mulf %2, %3 : vector<1x1x64xf32>
    %5 = arith.mulf %0, %0 : vector<1x32x64xf32>
    %cst_3 = arith.constant dense<0.000000e+00> : vector<1x64xf32>
    %6 = vector.multi_reduction <add>, %5, %cst_3 [1] : vector<1x32x64xf32> to vector<1x64xf32>
    %7 = vector.shape_cast %6 : vector<1x64xf32> to vector<1x1x64xf32>
    %cst_4 = arith.constant 3.125000e-02 : f32
    %8 = vector.broadcast %cst_4 : f32 to vector<1x1x64xf32>
    %9 = arith.mulf %7, %8 : vector<1x1x64xf32>
    %10 = arith.mulf %4, %4 : vector<1x1x64xf32>
    %11 = arith.subf %9, %10 : vector<1x1x64xf32>
    %cst_5 = arith.constant 0.000000e+00 : f32
    %12 = vector.broadcast %cst_5 : f32 to vector<1x1x64xf32>
    %13 = arith.maximumf %11, %12 : vector<1x1x64xf32>
    %cst_6 = arith.constant 9.99999974E-6 : f32
    %14 = vector.broadcast %cst_6 : f32 to vector<1x1x64xf32>
    %15 = arith.addf %13, %14 : vector<1x1x64xf32>
    %16 = math.rsqrt %15 : vector<1x1x64xf32>
    %c0_7 = arith.constant 0 : index
    %c0_8 = arith.constant 0 : index
    %17 = vector.load %arg3[%c0_7, %c0_8] : memref<32x1xf32, #tpu.memory_space<vmem>>, vector<32x1xf32>
    %18 = vector.shape_cast %17 : vector<32x1xf32> to vector<1x32x1xf32>
    %c0_9 = arith.constant 0 : index
    %c0_10 = arith.constant 0 : index
    %19 = vector.load %arg4[%c0_9, %c0_10] : memref<32x1xf32, #tpu.memory_space<vmem>>, vector<32x1xf32>
    %20 = vector.shape_cast %19 : vector<32x1xf32> to vector<1x32x1xf32>
    %21 = vector.broadcast %4 : vector<1x1x64xf32> to vector<1x32x64xf32>
    %22 = arith.subf %0, %21 : vector<1x32x64xf32>
    %23 = vector.broadcast %16 : vector<1x1x64xf32> to vector<1x32x64xf32>
    %24 = arith.mulf %22, %23 : vector<1x32x64xf32>
    %25 = vector.broadcast %18 : vector<1x32x1xf32> to vector<1x32x64xf32>
    %26 = arith.mulf %24, %25 : vector<1x32x64xf32>
    %27 = vector.broadcast %20 : vector<1x32x1xf32> to vector<1x32x64xf32>
    %28 = arith.addf %26, %27 : vector<1x32x64xf32>
    %c0_11 = arith.constant 0 : index
    %c0_12 = arith.constant 0 : index
    %c0_13 = arith.constant 0 : index
    %29 = vector.load %arg5[%c0_11, %c0_12, %c0_13] : memref<1x32x64xf32, #tpu.memory_space<vmem>>, vector<1x32x64xf32>
    tpu.vector_store %arg5[%c0_11, %c0_12, %c0_13], %28 {strides = array<i32>} : memref<1x32x64xf32, #tpu.memory_space<vmem>>, vector<1x32x64xf32>,
    return
  }
  func.func @transform_0(%arg0: i32, %arg1: i32) -> (i32, i32, i32) {
    %c0_i32 = arith.constant 0 : i32
    %c0_i32_0 = arith.constant 0 : i32
    return %arg0, %c0_i32, %arg1 : i32, i32, i32
  }
  func.func @transform_1(%arg0: i32, %arg1: i32) -> (i32, i32) {
    %c0_i32 = arith.constant 0 : i32
    %c0_i32_0 = arith.constant 0 : i32
    %c0_i32_1 = arith.constant 0 : i32
    return %c0_i32, %c0_i32_0 : i32, i32
  }
  func.func @transform_2(%arg0: i32, %arg1: i32) -> (i32, i32) {
    %c0_i32 = arith.constant 0 : i32
    %c0_i32_0 = arith.constant 0 : i32
    %c0_i32_1 = arith.constant 0 : i32
    return %c0_i32, %c0_i32_0 : i32, i32
  }
  func.func @transform_3(%arg0: i32, %arg1: i32) -> (i32, i32, i32) {
    %c0_i32 = arith.constant 0 : i32
    %c0_i32_0 = arith.constant 0 : i32
    return %arg0, %c0_i32, %arg1 : i32, i32, i32
  }
}

</mosaic_0001>

<bundles_post_ra>
// kernel: tpu_custom_call.1
= control target key start
LH: loop header
LB: loop body
LE: loop exit
PB: predicated region body
PF: predicated region fallthrough
CT: control target
= control target key end

     0   :  { %8 = vsyncpa [#allocation3], 0  ;;  %s738_s0 = inlined_call_operand.vmem [shape: f32[2,32,64], index: 0, kind: input, shape index: {}]   ;;  %s739_s1 = inlined_call_operand.vmem [shape: f32[32,1], index: 1, kind: input, shape index: {}]   ;;  %s740_s2 = inlined_call_operand.vmem [shape: f32[32,1], index: 2, kind: input, shape index: {}]   ;;  %s741_s3 = inlined_call_operand.hbm [shape: f32[2,32,64], index: 3, kind: output, shape index: {}]  }
   0x1   :  { %10 = vsyncpa [#allocation3 + $0x1], 0  ;;  %s589_s12 = smov 0   ;;  %s591_s13 = smov 0  }
   0x2   :  { %s593_s14 = smov 0   ;;  %s595_s15 = smov 0  }
   0x3   :  { %s597_s16 = smov 0   ;;  %s599_s17 = smov 0  }
   0x4 LB: > { %s408_s18 = sadd.s32 4294967295, %s564_s17   ;;  %s409_s19 = sadd.s32 4294967294, %s564_s17   ;;  %s564_s17 = sphi %s599_s17, %s16_s17   ;;  %s560_s16 = sphi %s597_s16, %s748_s16   ;;  %s556_s15 = sphi %s595_s15, %s747_s15   ;;  %s552_s14 = sphi %s593_s14, %s746_s14   ;;  %s548_s13 = sphi %s591_s13, %s745_s13   ;;  %s544_s12 = sphi %s589_s12, %s744_s12  }
   0x5   : > { %s28_s20 = sadd.s32 1, %s560_s16  ;;  %s107_s21 = sadd.s32 1, %s552_s14 }
   0x6   : > { %p30_p0 = scmp.ge.s32.totalorder %s28_s20, 2  ;;  %p117_p1 = scmp.ne.s32.totalorder %s552_s14, %s548_s13 }
   0x7   : > { %p118_p2 = scmp.eq.s32.totalorder %s408_s18, 1  ;;  %p123_p3 = scmp.ne.s32.totalorder %s548_s13, %s544_s12 }
   0x8   : > { %s750_s20 = smov (%p30_p0, %s28_s20), 0  ;;  %p124_p5 = scmp.eq.s32.totalorder %s409_s19, 1 }
   0x9   : > { %p629_p4 = por %p118_p2, %p117_p1  ;;  %s102_s23 = ssub.s32 %s560_s16, %s750_s20 }
   0xa   : > { %p412_p6 = scmp.ge.s32.totalorder %s564_s17, 1  ;;  %p105_p7 = scmp.eq.s32.totalorder %s102_s23, 0 }
   0xb   : > { %p636_p8 = por %p124_p5, %p123_p3  ;;  %p159_p9 = scmp.lt.s32.totalorder %s564_s17, 3 }
   0xc   : > { %s642_s25 = scalar_select %p105_p7, %s552_s14, %s107_s21  }
   0xd   : > { %p160_p10 = pnand %p412_p6, %p159_p9 }
   0xe   : > { %p186_p11 = scmp.lt.s32.totalorder (!%p160_p10), %s556_s15, 1  ;;  %s183_s30 = sand.u32 (!%p160_p10), 1, %s548_s13  }
   0xf   : > { %163 = sbr.rel (%p160_p10) target bundleno = 160 (0xa0), region = 32  ;;  %s413_s4 = sshll.u32 (!%p160_p10), %s183_s30, 5 }
  0x10   : > { %s185_s5 = scalar_lea.vmem (!%p160_p10), [#allocation2], %s413_s4  ;;  %s422_s6 = sshll.u32 (!%p160_p10), %s556_s15, 5 }
  0x11   : > { %s326_s9 = scalar_lea.hbm (!%p160_p10), %s741_s3, %s422_s6  ;;  %s327_s10 = sshll.u32 (!%p160_p10), %s185_s5, 4  ;;  %s328_s10 = int_to_ptr.vmem [resolvable:$true] %s327_s10 }
  0x12   : > { %s329_s11 = sshll.u32 (!%p160_p10), %s326_s9, 4  ;;  %s330_s11 = int_to_ptr.hbm [resolvable:$true] %s329_s11 }
  0x13   : > { %s500_s18 = sshra.s32 (!%p160_p10), %s330_s11, 4  ;;  %s501_s18 = int_to_ptr.hbm [resolvable:$true] %s500_s18 }
  0x14   : > { %v247_v0 = vld [vmem:[%s739_s1 + $0x10] sm:$0xff]  ;;  %v245_v1 = vld [vmem:[%s739_s1] sm:$0xff]  ;;  %v566_v2 = vmov 0   ;;  %v248_v4 = vld [vmem:[%s739_s1 + $0x18] sm:$0xff]  ;;  %s187_s23 = scalar_select %p186_p11, %s556_s15, 1  ;;  %vm198_vm0 = vcmask 523264  }
  0x15   : > { %482 = vset.pattern.permute.xlu1 %v566_v2  ;;  %481 = vset.pattern.permute.xlu0 %v566_v2  ;;  %v249_v3 = vld [vmem:[%s740_s2] sm:$0xff]  ;;  %v246_v5 = vld [vmem:[%s739_s1 + $0x8] sm:$0xff]  ;;  %v252_v7 = vld [vmem:[%s740_s2 + $0x18] sm:$0xff]  ;;  %s314_s15 = scalar_lea.sflag [#allocation3], %s183_s30  ;;  %s502_s19 = scalar_lea.hbm %s501_s18, 32 }
  0x16   : > { %273 = vperm.xlu1 %482, %v247_v0   ;;  %263 = vperm.xlu0 %481, %v245_v1   ;;  %v250_v6 = vld [vmem:[%s740_s2 + $0x8] sm:$0xff]  ;;  %v251_v8 = vld [vmem:[%s740_s2 + $0x10] sm:$0xff]  ;;  %s421_s26 = sshll.u32 %s187_s23, 5  ;;  %p503_p12 = scmp.ne.s32.totalorder %s501_s18, %s502_s19 }
  0x17   : > { %483 = vset.pattern.permute.xlu2 %v566_v2  ;;  %s193_s29 = scalar_lea.vmem %s738_s0, %s421_s26  ;;  %s506_s26 = scalar_lea.hbm %s741_s3, 64 }
  0x18   : > { %287 = vperm.xlu2 %483, %v249_v3   ;;  %v194_v9 = vld [vmem:[%s193_s29] sm:$0xff]  ;;  %v673_v10 = vld [vmem:[%s193_s29 + $0x8] sm:$0xff]  ;;  %v680_v15 = vld [vmem:[%s193_s29 + $0x10] sm:$0xff]  ;;  %p504_p13 = pnand %p503_p12, %p629_p4  ;;  %p507_p1 = scmp.lt.s32.totalorder %s501_s18, %s741_s3 }
  0x19   : > { %v199_v11 = vsel %vm198_vm0, %v194_v9, 0.0  ;;  %v200_v12 = vsel %vm198_vm0, %v673_v10, 0.0  ;;  %v213_v13 = vmul.f32 %v194_v9, %v194_v9  ;;  %v214_v14 = vmul.f32 %v673_v10, %v673_v10  ;;  %v197_v21 = vld [vmem:[%s193_s29 + $0x18] sm:$0xff]  ;;  %p508_p2 = scmp.lt.s32.totalorder %s506_s26, %s502_s19 }
  0x1a   : > { %v201_v16 = vadd.f32 %v200_v12, %v199_v11  ;;  %v202_v17 = vsel %vm198_vm0, %v680_v15, 0.0  ;;  %v215_v18 = vmul.f32 %v680_v15, %v680_v15  ;;  %v204_v24 = vsel %vm198_vm0, %v197_v21, 0.0  ;;  %p505_p0 = pneg %p504_p13 }
  0x1b   : > { %v217_v19 = vsel %vm198_vm0, %v213_v13, 0.0  ;;  %v218_v20 = vsel %vm198_vm0, %v214_v14, 0.0  ;;  %v216_v25 = vmul.f32 %v197_v21, %v197_v21  ;;  %p509_p3 = por %p508_p2, %p507_p1 }
  0x1c   : > { %v203_v22 = vadd.f32 %v202_v17, %v201_v16  ;;  %v219_v23 = vadd.f32 %v218_v20, %v217_v19  ;;  %v220_v26 = vsel %vm198_vm0, %v215_v18, 0.0 }
  0x1d   : > { %v222_v29 = vsel %vm198_vm0, %v216_v25, 0.0  ;;  %p510_p5 = pnand %p509_p3, %p505_p0 }
  0x1e   : > { %278 = vperm.xlu1 %482, %v248_v4   ;;  %268 = vperm.xlu0 %481, %v246_v5   ;;  %v205_v27 = vadd.f32 %v204_v24, %v203_v22  ;;  %v221_v28 = vadd.f32 %v220_v26, %v219_v23 }
  0x20   : > { %292 = vperm.xlu2 %483, %v250_v6   ;;  %v206_v30 = vrot.slane %v205_v27, 4  ;;  %v223_v31 = vadd.f32 %v222_v29, %v221_v28 }
  0x22   : > { %v207_v32 = vadd.f32 %v206_v30, %v205_v27  ;;  %v224_v33 = vrot.slane %v223_v31, 4 }
  0x24   : > { %v208_v34 = vrot.slane %v207_v32, 2  ;;  %v225_v35 = vadd.f32 %v224_v33, %v223_v31 }
  0x26   : > { %302 = vperm.xlu1 %482, %v252_v7   ;;  %297 = vperm.xlu0 %481, %v251_v8   ;;  %v209_v36 = vadd.f32 %v208_v34, %v207_v32  ;;  %v226_v37 = vrot.slane %v225_v35, 2 }
  0x28   : > { %v210_v38 = vrot.slane %v209_v36, 1  ;;  %v227_v39 = vadd.f32 %v226_v37, %v225_v35 }
  0x2a   : > { %v211_v40 = vadd.f32 %v210_v38, %v209_v36  ;;  %v228_v41 = vrot.slane %v227_v39, 1 }
  0x2c   : > { %v212_v42 = vmul.f32 0.03125, %v211_v40  ;;  %v229_v43 = vadd.f32 %v228_v41, %v227_v39 }
  0x2e   : > { %v230_v44 = vmul.f32 0.03125, %v229_v43  ;;  %v231_v45 = vmul.f32 %v212_v42, %v212_v42  ;;  %v253_v55 = vsub.f32 %v194_v9, %v212_v42  ;;  %v254_v62 = vsub.f32 %v673_v10, %v212_v42 }
  0x2f   : > { %v255_v1 = vsub.f32 %v680_v15, %v212_v42  ;;  %v256_v2 = vsub.f32 %v197_v21, %v212_v42 }
  0x30   : > { %v232_v46 = vsub.f32 %v230_v44, %v231_v45 }
  0x32   : > { %v233_v47 = vmax.f32 %v232_v46, 0.0 }
  0x34   : > { %v234_v48 = vadd.f32 1e-05, %v233_v47 }
  0x36   : > { %484 = vrsqrt.f32 %v234_v48  ;;  %vm241_vm1 = vweird.f32 %v234_v48 }
  0x3c   : > { %v485_v49 = vpop.eup %484 }
  0x3d   : > { %v236_v50 = vmul.f32 %v485_v49, %v234_v48  ;;  %vm242_vm2 = vweird.f32 %v485_v49 }
  0x3e   : > { %vm243_vm3 = vmor %vm241_vm1, %vm242_vm2 }
  0x3f   : > { %v237_v51 = vmul.f32 %v485_v49, %v236_v50 }
  0x41   : > { %v238_v52 = vmul.f32 0.5, %v237_v51 }
  0x43   : > { %v239_v53 = vsub.f32 1.5, %v238_v52 }
  0x45   : > { %v240_v54 = vmul.f32 %v485_v49, %v239_v53 }
  0x47   : > { %v244_v56 = vsel %vm243_vm3, %v485_v49, %v240_v54 }
  0x48   : > { %v257_v57 = vmul.f32 %v253_v55, %v244_v56  ;;  %v258_v0 = vmul.f32 %v254_v62, %v244_v56  ;;  %v259_v7 = vmul.f32 %v255_v1, %v244_v56  ;;  %v260_v8 = vmul.f32 %v256_v2, %v244_v56 }
  0x72   : > { %v288_v58 = vpop.permute.xlu2 %287 }
  0x7a   : > { %v293_v6 = vpop.permute.xlu2 %292 }
  0x88   : > { %v274_v59 = vpop.permute.xlu1 %273  ;;  %v264_v60 = vpop.permute.xlu0 %263 }
  0x89   : > { %v281_v61 = vmul.f32 %v264_v60, %v257_v57  ;;  %v283_v10 = vmul.f32 %v274_v59, %v259_v7 }
  0x8b   : > { %v305_v63 = vadd.f32 %v288_v58, %v281_v61 }
  0x8d   : > { %309 = vst.msk [vmem:[%s185_s5] sm:$0xff] %vm198_vm0, %v305_v63 }
  0x90   : > { %v279_v3 = vpop.permute.xlu1 %278  ;;  %v269_v4 = vpop.permute.xlu0 %268 }
  0x91   : > { %v282_v5 = vmul.f32 %v269_v4, %v258_v0  ;;  %v284_v11 = vmul.f32 %v279_v3, %v260_v8 }
  0x93   : > { %v306_v9 = vadd.f32 %v293_v6, %v282_v5 }
  0x95   : > { %310 = vst.msk [vmem:[%s185_s5 + $0x8] sm:$0xff] %vm198_vm0, %v306_v9 }
  0x98   : > { %v303_v12 = vpop.permute.xlu1 %302  ;;  %v298_v13 = vpop.permute.xlu0 %297 }
  0x99   : > { %v308_v14 = vadd.f32 %v303_v12, %v284_v11  ;;  %v307_v15 = vadd.f32 %v298_v13, %v283_v10 }
  0x9b   : > { %312 = vst.msk [vmem:[%s185_s5 + $0x18] sm:$0xff] %vm198_vm0, %v308_v14 }
  0x9c   : > { %311 = vst.msk [vmem:[%s185_s5 + $0x10] sm:$0xff] %vm198_vm0, %v307_v15 }
  0x9d   : > { %513 = shalt.err (!%p510_p5)
}
  0x9e   : > { %s567_s29 = smov 128   ;;  %s568_s30 = smov 8  }
  0x9f   : > { %423 = dma.vmem_to_hbm [thread:$0]  (%p629_p4), %s328_s10, 512, %s330_s11, %s314_s15, %s567_s29, %s567_s29, %s568_s30  }
  0xa0 PF: > { %p429_p6 = scmp.ge.s32.totalorder %s564_s17, 2  ;;  %s344_s4 = sand.u32 1, %s544_s12  }
  0xa1   : > { %s345_s5 = scalar_lea.sflag [#allocation3], %s344_s4 }
  0xa2   : > { %p426_p7 = pnand %p429_p6, %p636_p8 }
  0xa4   : > { %p427_p9 = pneg %p426_p7 }
  0xa6   : > { %539 = dma.done.wait (%p427_p9), %s345_s5, 512  }
  0xa7   : > { %541 = vsyncadd (%p427_p9), %s345_s5, 4294966784  ;;  %s16_s17 = sadd.s32 1, %s564_s17   ;;  %s744_s12 = smov %s548_s13 }
  0xa8   : > { %p13_p10 = scmp.ge.s32.totalorder %s16_s17, 4   ;;  %s745_s13 = smov %s552_s14 }
  0xa9   : > { %s746_s14 = smov %s642_s25  ;;  %s747_s15 = smov %s560_s16 }
  0xaa   : > { %s748_s16 = smov %s750_s20  ;;  %15 = sbr.rel (!%p13_p10) target bundleno = 4 (0x4), region = 67 }
  0xaf   :  { %351 = vsyncpa [#allocation3], 1 }
  0xb0   :  { %353 = vsyncpa [#allocation3 + $0x1], 1 }

</bundles_post_ra>
